<compile_context>
chip_gen: v6e
topology: v6e:2x2x1
jax: 0.10.0
libtpu: 0.0.40
codegen_flags: <defaults>
</compile_context>

<pallas_src>
import functools

import jax
import jax.numpy as jnp
from jax.experimental import pallas as pl
from jax.experimental.pallas import tpu as pltpu


def _layernorm2d_kernel(x_ref, w_ref, b_ref, o_ref, *, eps, inv_c):
    # x_ref/o_ref: (BN, C, TILE_HW); w_ref/b_ref: (1, C, 1).
    # Channel reduction is over axis=1 (sublanes); lanes (H*W) are independent.
    x = x_ref[...].astype(jnp.float32)
    s = jnp.sum(x, axis=1, keepdims=True)
    ss = jnp.sum(x * x, axis=1, keepdims=True)
    mu = s * inv_c
    # Biased variance (matches .pow(2).mean(1)); clamp tiny negative fp error.
    var = jnp.maximum(ss * inv_c - mu * mu, 0.0)
    inv_std = jax.lax.rsqrt(var + eps)          # EUP rsqrt, no divide
    y = (x - mu) * inv_std
    o_ref[...] = (w_ref[...] * y + b_ref[...]).astype(o_ref.dtype)


def layernorm2d(x, weight, bias, eps=1e-6, tile_hw=None, tile_n=None,
                vmem_limit_bytes=32 * 1024 * 1024):
    """Channel-wise LayerNorm. x: (N, C, H, W); weight/bias: (C,). Returns NCHW."""
    N, C, H, W = x.shape
    HW = H * W

    # Free reshape (contiguous trailing dims merge) — no transposes, no padding.
    x3 = x.reshape(N, C, HW)
    w3 = weight.astype(jnp.float32).reshape(1, C, 1)
    b3 = bias.astype(jnp.float32).reshape(1, C, 1)

    itemsize = jnp.dtype(x.dtype).itemsize
    # Per (batch-row x lane-column): double-buffered in + out blocks plus f32
    # working copies inside the kernel.
    bytes_per_col = C * (4 * itemsize + 2 * 4)
    # Keep well under the scoped limit so the pipeline stays double-buffered
    # even on v7x (64 MiB physical VMEM) and under the raised v5e limit.
    budget = min(vmem_limit_bytes // 2, 16 * 1024 * 1024)

    if tile_hw is None:
        max_tile_hw = max(128, (budget // bytes_per_col) // 128 * 128)
        tile_hw = HW if HW <= max_tile_hw else max_tile_hw
    if tile_n is None:
        if tile_hw >= HW:
            # Whole spatial extent fits in one block: grow the batch dim of the
            # block instead, so small-HW / large-N shapes don't pay a grid step
            # per image.
            tile_n = max(1, min(N, budget // (bytes_per_col * HW)))
        else:
            tile_n = 1

    grid = (pl.cdiv(N, tile_n), pl.cdiv(HW, tile_hw))  # ragged blocks handled by Pallas

    kernel = functools.partial(_layernorm2d_kernel, eps=eps, inv_c=1.0 / C)

    out3 = pl.pallas_call(
        kernel,
        out_shape=jax.ShapeDtypeStruct((N, C, HW), x.dtype),
        grid_spec=pltpu.PrefetchScalarGridSpec(
            num_scalar_prefetch=0,
            grid=grid,
            in_specs=[
                pl.BlockSpec((tile_n, C, tile_hw), lambda n, t: (n, 0, t)),
                pl.BlockSpec((1, C, 1), lambda n, t: (0, 0, 0)),
                pl.BlockSpec((1, C, 1), lambda n, t: (0, 0, 0)),
            ],
            out_specs=pl.BlockSpec((tile_n, C, tile_hw), lambda n, t: (n, 0, t)),
        ),
        compiler_params=pltpu.CompilerParams(
            # Both axes independent -> megacore / v7x dual-TC sharding allowed.
            dimension_semantics=("parallel", "parallel"),
            vmem_limit_bytes=vmem_limit_bytes,
        ),
    )(x3, w3, b3)

    return out3.reshape(N, C, H, W)


def _reference(x, weight, bias, eps=1e-6):
    mu = jnp.mean(x, axis=1, keepdims=True)
    var = jnp.mean((x - mu) ** 2, axis=1, keepdims=True)
    y = (x - mu) / jnp.sqrt(var + eps)
    return weight.reshape(1, -1, 1, 1) * y + bias.reshape(1, -1, 1, 1)


if __name__ == "__main__":
    key = jax.random.PRNGKey(0)
    N, C, H, W = 2, 4, 16, 16
    kx, kw, kb = jax.random.split(key, 3)

    x = jax.random.normal(kx, (N, C, H, W), dtype=jnp.float32)
    # Module init: weight = ones(C), bias = zeros(C). Perturb deterministically
    # so the affine path is exercised.
    weight = jnp.ones((C,), jnp.float32) + 0.1 * jax.random.normal(kw, (C,), jnp.float32)
    bias = jnp.zeros((C,), jnp.float32) + 0.1 * jax.random.normal(kb, (C,), jnp.float32)

    out = layernorm2d(x, weight, bias, eps=1e-6)
    out = jax.block_until_ready(out)

    ref = _reference(x, weight, bias, eps=1e-6)
    assert out.shape == (N, C, H, W)
    assert jnp.allclose(out, ref, atol=1e-5, rtol=1e-5), "mismatch vs reference"

    # TODO(synk): custom backward (LayerNormFunction.backward) not implemented; forward only.
    print("KERNEL_OK")
</pallas_src>

<mosaic_0001>
module attributes {stable_mosaic.version = 11 : i64} {
  func.func @_layernorm2d_kernel(%arg0: i32, %arg1: i32, %arg2: memref<2x4x256xf32, #tpu.memory_space<vmem>>, %arg3: memref<1x4x1xf32, #tpu.memory_space<vmem>>, %arg4: memref<1x4x1xf32, #tpu.memory_space<vmem>>, %arg5: memref<2x4x256xf32, #tpu.memory_space<vmem>>) attributes {dimension_semantics = [#tpu.dimension_semantics<parallel>, #tpu.dimension_semantics<parallel>], iteration_bounds = array<i64: 1, 1>, scalar_prefetch = 0 : i64, scratch_operands = 0 : i64, tpu.core_type = #tpu.core_type<tc>, window_params = [{transform_indices = @transform_0, window_bounds = array<i64: 2, 4, 256>}, {pipeline_mode = #tpu.pipeline_mode<synchronous>, transform_indices = @transform_1, window_bounds = array<i64: 1, 4, 1>}, {pipeline_mode = #tpu.pipeline_mode<synchronous>, transform_indices = @transform_2, window_bounds = array<i64: 1, 4, 1>}, {transform_indices = @transform_3, window_bounds = array<i64: 2, 4, 256>}]} {
    %c0 = arith.constant 0 : index
    %c0_0 = arith.constant 0 : index
    %c0_1 = arith.constant 0 : index
    %0 = vector.load %arg2[%c0, %c0_0, %c0_1] : memref<2x4x256xf32, #tpu.memory_space<vmem>>, vector<2x4x256xf32>
    %cst = arith.constant dense<0.000000e+00> : vector<2x256xf32>
    %1 = vector.multi_reduction <add>, %0, %cst [1] : vector<2x4x256xf32> to vector<2x256xf32>
    %2 = vector.shape_cast %1 : vector<2x256xf32> to vector<2x1x256xf32>
    %3 = arith.mulf %0, %0 : vector<2x4x256xf32>
    %cst_2 = arith.constant dense<0.000000e+00> : vector<2x256xf32>
    %4 = vector.multi_reduction <add>, %3, %cst_2 [1] : vector<2x4x256xf32> to vector<2x256xf32>
    %5 = vector.shape_cast %4 : vector<2x256xf32> to vector<2x1x256xf32>
    %cst_3 = arith.constant 2.500000e-01 : f32
    %6 = vector.broadcast %cst_3 : f32 to vector<2x1x256xf32>
    %7 = arith.mulf %2, %6 : vector<2x1x256xf32>
    %cst_4 = arith.constant 2.500000e-01 : f32
    %8 = vector.broadcast %cst_4 : f32 to vector<2x1x256xf32>
    %9 = arith.mulf %5, %8 : vector<2x1x256xf32>
    %10 = arith.mulf %7, %7 : vector<2x1x256xf32>
    %11 = arith.subf %9, %10 : vector<2x1x256xf32>
    %cst_5 = arith.constant 0.000000e+00 : f32
    %12 = vector.broadcast %cst_5 : f32 to vector<2x1x256xf32>
    %13 = arith.maximumf %11, %12 : vector<2x1x256xf32>
    %cst_6 = arith.constant 9.99999997E-7 : f32
    %14 = vector.broadcast %cst_6 : f32 to vector<2x1x256xf32>
    %15 = arith.addf %13, %14 : vector<2x1x256xf32>
    %16 = math.rsqrt %15 : vector<2x1x256xf32>
    %17 = vector.broadcast %7 : vector<2x1x256xf32> to vector<2x4x256xf32>
    %18 = arith.subf %0, %17 : vector<2x4x256xf32>
    %19 = vector.broadcast %16 : vector<2x1x256xf32> to vector<2x4x256xf32>
    %20 = arith.mulf %18, %19 : vector<2x4x256xf32>
    %c0_7 = arith.constant 0 : index
    %c0_8 = arith.constant 0 : index
    %c0_9 = arith.constant 0 : index
    %21 = vector.load %arg3[%c0_7, %c0_8, %c0_9] : memref<1x4x1xf32, #tpu.memory_space<vmem>>, vector<1x4x1xf32>
    %22 = vector.broadcast %21 : vector<1x4x1xf32> to vector<2x4x256xf32>
    %23 = arith.mulf %22, %20 : vector<2x4x256xf32>
    %c0_10 = arith.constant 0 : index
    %c0_11 = arith.constant 0 : index
    %c0_12 = arith.constant 0 : index
    %24 = vector.load %arg4[%c0_10, %c0_11, %c0_12] : memref<1x4x1xf32, #tpu.memory_space<vmem>>, vector<1x4x1xf32>
    %25 = vector.broadcast %24 : vector<1x4x1xf32> to vector<2x4x256xf32>
    %26 = arith.addf %23, %25 : vector<2x4x256xf32>
    %c0_13 = arith.constant 0 : index
    %c0_14 = arith.constant 0 : index
    %c0_15 = arith.constant 0 : index
    %27 = vector.load %arg5[%c0_13, %c0_14, %c0_15] : memref<2x4x256xf32, #tpu.memory_space<vmem>>, vector<2x4x256xf32>
    tpu.vector_store %arg5[%c0_13, %c0_14, %c0_15], %26 {strides = array<i32>} : memref<2x4x256xf32, #tpu.memory_space<vmem>>, vector<2x4x256xf32>,
    return
  }
  func.func @transform_0(%arg0: i32, %arg1: i32) -> (i32, i32, i32) {
    %c0_i32 = arith.constant 0 : i32
    %c0_i32_0 = arith.constant 0 : i32
    return %arg0, %c0_i32, %arg1 : i32, i32, i32
  }
  func.func @transform_1(%arg0: i32, %arg1: i32) -> (i32, i32, i32) {
    %c0_i32 = arith.constant 0 : i32
    %c0_i32_0 = arith.constant 0 : i32
    %c0_i32_1 = arith.constant 0 : i32
    %c0_i32_2 = arith.constant 0 : i32
    return %c0_i32, %c0_i32_0, %c0_i32_1 : i32, i32, i32
  }
  func.func @transform_2(%arg0: i32, %arg1: i32) -> (i32, i32, i32) {
    %c0_i32 = arith.constant 0 : i32
    %c0_i32_0 = arith.constant 0 : i32
    %c0_i32_1 = arith.constant 0 : i32
    %c0_i32_2 = arith.constant 0 : i32
    return %c0_i32, %c0_i32_0, %c0_i32_1 : i32, i32, i32
  }
  func.func @transform_3(%arg0: i32, %arg1: i32) -> (i32, i32, i32) {
    %c0_i32 = arith.constant 0 : i32
    %c0_i32_0 = arith.constant 0 : i32
    return %arg0, %c0_i32, %arg1 : i32, i32, i32
  }
}

</mosaic_0001>

<bundles_post_ra>
// kernel: tpu_custom_call.1
= control target key start
LH: loop header
LB: loop body
LE: loop exit
PB: predicated region body
PF: predicated region fallthrough
CT: control target
= control target key end

     0   :  { %8 = vsyncpa [#allocation3], 0  ;;  %s330_s0 = inlined_call_operand.hbm [shape: f32[2,4,256], index: 0, kind: input, shape index: {}]   ;;  %s331_s1 = inlined_call_operand.vmem [shape: f32[1,4,1], index: 1, kind: input, shape index: {}]   ;;  %s332_s2 = inlined_call_operand.vmem [shape: f32[1,4,1], index: 2, kind: input, shape index: {}]   ;;  %s333_s3 = inlined_call_operand.hbm [shape: f32[2,4,256], index: 3, kind: output, shape index: {}]  }
   0x1   :  { %9 = vsyncpa [#allocation4], 0  ;;  %s263_s12 = smov [#allocation2]  }
   0x2   :  { %s15_s13 = sshll.u32 %s263_s12, 4  ;;  %s16_s13 = int_to_ptr.vmem [resolvable:$true] %s15_s13 }
   0x3   :  { %s227_s14 = scalar_lea.vmem %s16_s13, 256  ;;  %p232_p1 = scmp.lt.s32.totalorder %s16_s13, %s16_s13 }
   0x4   :  { %p228_p0 = scmp.ne.s32.totalorder %s16_s13, %s227_s14  ;;  %p233_p2 = scmp.lt.s32.totalorder %s227_s14, %s227_s14 }
   0x6   :  { %p234_p3 = por %p233_p2, %p232_p1 }
   0x8   :  { %p235_p4 = pnand %p234_p3, %p228_p0 }
   0xa   :  { %238 = shalt.err (!%p235_p4)
}
   0xb   :  { %s264_s15 = smov 128   ;;  %s265_s16 = smov 8  }
   0xc   :  { %21 = dma.hbm_to_vmem [thread:$0]  %s330_s0, 256, %s16_s13, [#allocation3], %s264_s15, %s264_s15, %s265_s16  }
   0xd   :  { %259 = dma.done.wait [#allocation3], 256  }
   0xe   :  { %260 = vsyncadd [#allocation3], 4294967040  ;;  %v266_v0 = vmov 0   ;;  %v150_v1 = vld [vmem:[%s331_s1] sm:$0xf]  ;;  %v302_v4 = vld [vmem:[#allocation2 + $0x8] sm:$0xff] }
   0xf   :  { %208 = vset.pattern.permute.xlu0 %v266_v0  ;;  %v166_v2 = vld [vmem:[%s332_s2] sm:$0xf]  ;;  %vm37_vm0 = vcmask 1043456   ;;  %v34_v7 = vcombine.high %v302_v4, %v302_v4  ;;  %v67_v8 = vmul.f32 %v302_v4, %v302_v4  ;;  %s267_s0 = smov [#allocation5]  }
  0x10   :  { %153 = vperm.xlu0 %208, %v150_v1   ;;  %v300_v3 = vld [vmem:[#allocation2] sm:$0xff]  ;;  %v52_v12 = vsel %vm37_vm0, %v302_v4, 0.0  ;;  %s191_s1 = sshll.u32 %s267_s0, 4  ;;  %s192_s1 = int_to_ptr.vmem [resolvable:$true] %s191_s1 }
  0x11   :  { %v33_v5 = vcombine.high %v300_v3, %v300_v3  ;;  %v66_v6 = vmul.f32 %v300_v3, %v300_v3  ;;  %v38_v9 = vsel %vm37_vm0, %v300_v3, 0.0  ;;  %v59_v14 = vsel %vm37_vm0, %v34_v7, 0.0  ;;  %s239_s2 = scalar_lea.vmem %s192_s1, 256  ;;  %p244_p6 = scmp.lt.s32.totalorder %s192_s1, %s192_s1 }
  0x12   :  { %v39_v13 = vrot.slane %v38_v9, 4  ;;  %v71_v15 = vcombine.high %v67_v8, %v67_v8  ;;  %v53_v18 = vrot.slane %v52_v12, 4  ;;  %v60_v20 = vrot.slane %v59_v14, 4  ;;  %p240_p5 = scmp.ne.s32.totalorder %s192_s1, %s239_s2  ;;  %p245_p7 = scmp.lt.s32.totalorder %s239_s2, %s239_s2 }
  0x13   :  { %v45_v10 = vsel %vm37_vm0, %v33_v5, 0.0  ;;  %v70_v11 = vcombine.high %v66_v6, %v66_v6  ;;  %v74_v17 = vsel %vm37_vm0, %v66_v6, 0.0  ;;  %v88_v21 = vsel %vm37_vm0, %v67_v8, 0.0 }
  0x14   :  { %169 = vperm.xlu0 %208, %v166_v2   ;;  %v46_v16 = vrot.slane %v45_v10, 4  ;;  %v40_v22 = vadd.f32 %v39_v13, %v38_v9  ;;  %v75_v23 = vrot.slane %v74_v17, 4  ;;  %v95_v24 = vsel %vm37_vm0, %v71_v15, 0.0  ;;  %p246_p8 = por %p245_p7, %p244_p6 }
  0x15   :  { %v81_v19 = vsel %vm37_vm0, %v70_v11, 0.0  ;;  %v54_v27 = vadd.f32 %v53_v18, %v52_v12  ;;  %v89_v28 = vrot.slane %v88_v21, 4  ;;  %v61_v29 = vadd.f32 %v60_v20, %v59_v14 }
  0x16   :  { %v47_v25 = vadd.f32 %v46_v16, %v45_v10  ;;  %v82_v26 = vrot.slane %v81_v19, 4  ;;  %v96_v30 = vrot.slane %v95_v24, 4  ;;  %v41_v31 = vrot.slane %v40_v22, 2  ;;  %p247_p9 = pnand %p246_p8, %p240_p5 }
  0x17   :  { %v76_v32 = vadd.f32 %v75_v23, %v74_v17  ;;  %v55_v35 = vrot.slane %v54_v27, 2  ;;  %v90_v36 = vadd.f32 %v89_v28, %v88_v21  ;;  %v62_v37 = vrot.slane %v61_v29, 2 }
  0x18   :  { %v48_v33 = vrot.slane %v47_v25, 2  ;;  %v83_v34 = vadd.f32 %v82_v26, %v81_v19  ;;  %v97_v38 = vadd.f32 %v96_v30, %v95_v24  ;;  %v42_v39 = vadd.f32 %v41_v31, %v40_v22 }
  0x19   :  { %v77_v40 = vrot.slane %v76_v32, 2  ;;  %v56_v43 = vadd.f32 %v55_v35, %v54_v27  ;;  %v91_v44 = vrot.slane %v90_v36, 2  ;;  %v63_v45 = vadd.f32 %v62_v37, %v61_v29 }
  0x1a   :  { %v49_v41 = vadd.f32 %v48_v33, %v47_v25  ;;  %v84_v42 = vrot.slane %v83_v34, 2  ;;  %v98_v46 = vrot.slane %v97_v38, 2  ;;  %v43_v47 = vrot.slane %v42_v39, 1 }
  0x1b   :  { %v78_v48 = vadd.f32 %v77_v40, %v76_v32  ;;  %v57_v51 = vrot.slane %v56_v43, 1  ;;  %v92_v52 = vadd.f32 %v91_v44, %v90_v36  ;;  %v64_v53 = vrot.slane %v63_v45, 1 }
  0x1c   :  { %v50_v49 = vrot.slane %v49_v41, 1  ;;  %v85_v50 = vadd.f32 %v84_v42, %v83_v34  ;;  %v99_v54 = vadd.f32 %v98_v46, %v97_v38  ;;  %v44_v55 = vadd.f32 %v43_v47, %v42_v39 }
  0x1d   :  { %v79_v56 = vrot.slane %v78_v48, 1  ;;  %v58_v59 = vadd.f32 %v57_v51, %v56_v43  ;;  %v93_v60 = vrot.slane %v92_v52, 1  ;;  %v65_v61 = vadd.f32 %v64_v53, %v63_v45 }
  0x1e   :  { %v51_v57 = vadd.f32 %v50_v49, %v49_v41  ;;  %v86_v58 = vrot.slane %v85_v50, 1  ;;  %v100_v62 = vrot.slane %v99_v54, 1  ;;  %v102_v0 = vmul.f32 0.25, %v44_v55 }
  0x1f   :  { %v80_v63 = vadd.f32 %v79_v56, %v78_v48  ;;  %v94_v5 = vadd.f32 %v93_v60, %v92_v52  ;;  %v104_v6 = vmul.f32 0.25, %v58_v59  ;;  %v105_v8 = vmul.f32 0.25, %v65_v61 }
  0x20   :  { %v87_v1 = vadd.f32 %v86_v58, %v85_v50  ;;  %v103_v2 = vmul.f32 0.25, %v51_v57  ;;  %v101_v7 = vadd.f32 %v100_v62, %v99_v54  ;;  %v110_v10 = vmul.f32 %v102_v0, %v102_v0 }
  0x21   :  { %v106_v9 = vmul.f32 0.25, %v80_v63  ;;  %v108_v13 = vmul.f32 0.25, %v94_v5  ;;  %v112_v14 = vmul.f32 %v104_v6, %v104_v6  ;;  %v113_v16 = vmul.f32 %v105_v8, %v105_v8 }
  0x22   :  { %v107_v11 = vmul.f32 0.25, %v87_v1  ;;  %v111_v12 = vmul.f32 %v103_v2, %v103_v2  ;;  %v109_v15 = vmul.f32 0.25, %v101_v7  ;;  %v134_v32 = vcombine.low %v102_v0, %v103_v2 }
  0x23   :  { %v114_v17 = vsub.f32 %v106_v9, %v110_v10  ;;  %v116_v19 = vsub.f32 %v108_v13, %v112_v14  ;;  %v135_v33 = vcombine.low %v104_v6, %v105_v8 }
  0x24   :  { %v115_v18 = vsub.f32 %v107_v11, %v111_v12  ;;  %v117_v20 = vsub.f32 %v109_v15, %v113_v16  ;;  %v138_v35 = vsub.f32 %v300_v3, %v134_v32 }
  0x25   :  { %v118_v21 = vmax.f32 %v114_v17, 0.0  ;;  %v120_v23 = vmax.f32 %v116_v19, 0.0  ;;  %v139_v36 = vsub.f32 %v302_v4, %v135_v33 }
  0x26   :  { %v119_v22 = vmax.f32 %v115_v18, 0.0  ;;  %v121_v24 = vmax.f32 %v117_v20, 0.0 }
  0x27   :  { %v122_v25 = vadd.f32 1e-06, %v118_v21  ;;  %v124_v27 = vadd.f32 1e-06, %v120_v23 }
  0x28   :  { %v123_v26 = vadd.f32 1e-06, %v119_v22  ;;  %v125_v28 = vadd.f32 1e-06, %v121_v24 }
  0x29   :  { %211 = vrsqrt.f32 %v122_v25 }
  0x2a   :  { %213 = vrsqrt.f32 %v123_v26 }
  0x2b   :  { %215 = vrsqrt.f32 %v124_v27 }
  0x2c   :  { %217 = vrsqrt.f32 %v125_v28 }
  0x36   :  { %v212_v29 = vpop.eup %211 }
  0x37   :  { %v214_v30 = vpop.eup %213 }
  0x38   :  { %v216_v31 = vpop.eup %215  ;;  %v144_v37 = vcombine.low %v212_v29, %v214_v30 }
  0x39   :  { %v218_v34 = vpop.eup %217 }
  0x3a   :  { %v145_v38 = vcombine.low %v216_v31, %v218_v34  ;;  %v148_v39 = vmul.f32 %v144_v37, %v138_v35 }
  0x3c   :  { %v149_v40 = vmul.f32 %v145_v38, %v139_v36  ;;  %v158_v41 = vcombine.high %v148_v39, %v148_v39 }
  0x3e   :  { %v159_v42 = vcombine.high %v149_v40, %v149_v40 }
  0x8b   :  { %v154_v43 = vpop.permute.xlu0 %153 }
  0x8c   :  { %v162_v44 = vmul.f32 %v154_v43, %v148_v39  ;;  %v163_v45 = vmul.f32 %v158_v41, %v154_v43  ;;  %v164_v46 = vmul.f32 %v154_v43, %v149_v40  ;;  %v165_v47 = vmul.f32 %v159_v42, %v154_v43 }
  0x8f   :  { %v170_v48 = vpop.permute.xlu0 %169 }
  0x90   :  { %v172_v49 = vadd.f32 %v170_v48, %v162_v44  ;;  %v173_v50 = vadd.f32 %v170_v48, %v163_v45  ;;  %v174_v51 = vadd.f32 %v170_v48, %v164_v46  ;;  %v175_v3 = vadd.f32 %v170_v48, %v165_v47 }
  0x92   :  { %v180_v52 = vcombine.low %v172_v49, %v173_v50  ;;  %v181_v4 = vcombine.low %v174_v51, %v175_v3 }
  0x94   :  { %184 = vst [vmem:[#allocation5] sm:$0xff] %v180_v52  ;;  %185 = vst [vmem:[#allocation5 + $0x8] sm:$0xff] %v181_v4 }
  0x95   :  { %250 = shalt.err (!%p247_p9)
}
  0x96   :  { %197 = dma.vmem_to_hbm [thread:$0]  %s192_s1, 256, %s333_s3, [#allocation4], %s264_s15, %s264_s15, %s265_s16  }
  0x97   :  { %261 = dma.done.wait [#allocation4], 256  }
  0x98   :  { %262 = vsyncadd [#allocation4], 4294967040 }
  0x99   :  { %201 = vsyncpa [#allocation3], 1 }
  0x9a   :  { %202 = vsyncpa [#allocation4], 1 }

</bundles_post_ra>
